<compile_context>
chip_gen: v7x
topology: tpu7x:2x2x1
jax: 0.10.0
libtpu: 0.0.40
codegen_flags: <defaults>
</compile_context>

<pallas_src>
import jax
import jax.numpy as jnp
from jax import lax
from jax.experimental import pallas as pl
from jax.experimental.pallas import tpu as pltpu


def _round_up(x: int, m: int) -> int:
    return ((x + m - 1) // m) * m


def _int_embed_mlp_kernel(idx_ref,            # VMEM (tn, 1)  int32
                          table_ref,          # VMEM (Vp, Dp) resident
                          w1_ref, b1_ref,     # VMEM (Dp, Dp), (1, Dp)
                          w2_ref, b2_ref,     # VMEM (Dp, Dp), (1, Dp)
                          out_ref):           # VMEM (tn, Dp) f32
    tn = out_ref.shape[0]
    vp = table_ref.shape[0]
    cdt = table_ref.dtype                     # compute dtype (f32 or bf16)

    # ---- embedding lookup: one-hot matmul against the VMEM-resident table ----
    # ids (tn, 1) broadcast against a lane iota (tn, Vp); padded vocab columns
    # never match (ids < V <= Vp) so they contribute exact zeros.
    ids = idx_ref[...]                                          # (tn, 1) int32
    vocab_iota = lax.broadcasted_iota(jnp.int32, (tn, vp), 1)   # (tn, Vp)
    onehot = (ids == vocab_iota).astype(cdt)                    # (tn, Vp)
    emb = jnp.dot(onehot, table_ref[...],
                  preferred_element_type=jnp.float32)           # (tn, Dp) f32

    # ---- Linear1 + ReLU (MXU, f32 accumulate; biases kept in f32) ----
    h1 = jnp.dot(emb.astype(cdt), w1_ref[...],
                 preferred_element_type=jnp.float32)
    h1 = jnp.maximum(h1 + b1_ref[...], 0.0)

    # ---- Linear2 + ReLU ----
    h2 = jnp.dot(h1.astype(cdt), w2_ref[...],
                 preferred_element_type=jnp.float32)
    h2 = jnp.maximum(h2 + b2_ref[...], 0.0)

    out_ref[...] = h2.astype(out_ref.dtype)


def pad_params(table, w1, b1, w2, b2, *, compute_dtype=jnp.float32):
    """Pad parameters once at init (hoisted out of the forward path).

    Feature dims are zero-padded to 128-lane multiples (exact: padded columns /
    rows contribute zeros).  Weights are stored as (in, out)."""
    V, D = table.shape
    Vp = _round_up(V, 128)
    Dp = _round_up(D, 128)
    cdt = compute_dtype
    table_p = jnp.zeros((Vp, Dp), cdt).at[:V, :D].set(table.astype(cdt))
    w1_p = jnp.zeros((Dp, Dp), cdt).at[:D, :D].set(w1.astype(cdt))
    w2_p = jnp.zeros((Dp, Dp), cdt).at[:D, :D].set(w2.astype(cdt))
    b1_p = jnp.zeros((1, Dp), jnp.float32).at[0, :D].set(b1.astype(jnp.float32))
    b2_p = jnp.zeros((1, Dp), jnp.float32).at[0, :D].set(b2.astype(jnp.float32))
    return dict(table=table_p, w1=w1_p, b1=b1_p, w2=w2_p, b2=b2_p, dims=(V, D))


def integer_embedding_forward(idx, params, *, tile_tokens=256):
    """idx: int array of any shape -> float32 array of shape idx.shape + (D,)."""
    V, D = params["dims"]
    table_p = params["table"]
    w1_p, b1_p = params["w1"], params["b1"]
    w2_p, b2_p = params["w2"], params["b2"]
    Vp, Dp = table_p.shape
    wbytes = jnp.dtype(table_p.dtype).itemsize

    orig_shape = idx.shape
    N = idx.size

    # Token tile: sublane multiple, capped by the token count.
    tile_tokens = max(8, _round_up(tile_tokens, 8))
    tn = min(tile_tokens, _round_up(N, 8))
    # Prefer >= 2 grid tiles when the token count allows it so the "parallel"
    # axis can shard across both TensorCores on v7x.
    if _round_up(N, 8) // tn < 2 and tn >= 16:
        tn = _round_up(tn // 2, 8)
    n_pad = _round_up(N, tn)
    n_tiles = n_pad // tn

    # Clamp ids to [0, V-1].  nn.Embedding would raise for out-of-range ids;
    # clamping just guarantees a well-defined lookup (padded tail ids read row
    # 0 and are sliced off below).
    idx_flat = jnp.clip(idx.reshape(N).astype(jnp.int32), 0, V - 1)
    idx_col = jnp.pad(idx_flat, (0, n_pad - N)).reshape(n_pad, 1)

    grid_spec = pltpu.PrefetchScalarGridSpec(
        num_scalar_prefetch=0,
        grid=(n_tiles,),
        in_specs=[
            pl.BlockSpec((tn, 1), lambda t: (t, 0)),      # token ids
            pl.BlockSpec((Vp, Dp), lambda t: (0, 0)),     # table (resident)
            pl.BlockSpec((Dp, Dp), lambda t: (0, 0)),     # w1    (resident)
            pl.BlockSpec((1, Dp),  lambda t: (0, 0)),     # b1    (resident)
            pl.BlockSpec((Dp, Dp), lambda t: (0, 0)),     # w2    (resident)
            pl.BlockSpec((1, Dp),  lambda t: (0, 0)),     # b2    (resident)
        ],
        out_specs=pl.BlockSpec((tn, Dp), lambda t: (t, 0)),
    )

    # Advisory cost for XLA scheduling.
    flops = 2 * n_pad * Vp * Dp + 2 * 2 * n_pad * Dp * Dp
    bytes_accessed = (n_pad * 4                      # ids
                      + Vp * Dp * wbytes             # table
                      + 2 * Dp * Dp * wbytes         # weights
                      + 2 * Dp * 4                   # biases
                      + n_pad * Dp * 4)              # output
    cost = pl.CostEstimate(flops=flops, transcendentals=0,
                           bytes_accessed=bytes_accessed)

    # VMEM budget derived from the actual tiles, capped at ~75% of physical
    # VMEM (v7x: ~48 MiB of 64; v5e/v6e: ~96 MiB of 128).
    tile_bytes = (2 * tn * Dp * 4                        # output (double-buffered)
                  + 2 * tn * 128 * 4                     # ids block (lane-padded)
                  + 2 * (Vp * Dp + 2 * Dp * Dp) * wbytes # table + weights (2x margin)
                  + 2 * 2 * Dp * 4                       # biases
                  + 2 * tn * max(Vp, Dp) * 4)            # one-hot / intermediates
    try:
        vmem_cap = int(pltpu.get_tpu_info().vmem_capacity_bytes)
    except Exception:
        vmem_cap = 64 << 20
    vmem_limit = int(min(max(2 * tile_bytes, 16 << 20), int(vmem_cap * 0.75)))

    out = pl.pallas_call(
        _int_embed_mlp_kernel,
        out_shape=jax.ShapeDtypeStruct((n_pad, Dp), jnp.float32),
        grid_spec=grid_spec,
        compiler_params=pltpu.CompilerParams(
            dimension_semantics=("parallel",),
            vmem_limit_bytes=vmem_limit,
        ),
        cost_estimate=cost,
    )(idx_col, table_p, w1_p, b1_p, w2_p, b2_p)

    return out[:N, :D].reshape(*orig_shape, D)


def _reference_forward(idx, table, w1, b1, w2, b2):
    emb = table[idx]                                   # (B, S, D)
    h1 = jnp.maximum(jnp.dot(emb, w1, precision=lax.Precision.HIGHEST) + b1, 0.0)
    h2 = jnp.maximum(jnp.dot(h1, w2, precision=lax.Precision.HIGHEST) + b2, 0.0)
    return h2


if __name__ == "__main__":
    # Small shapes consistent with the module.
    num_embeddings = 16   # vocabulary size V
    embedding_dim = 32    # D
    B, S = 2, 8

    key = jax.random.PRNGKey(0)
    k_idx, k_tab, k_w1, k_b1, k_w2, k_b2 = jax.random.split(key, 6)

    # Deterministic synthetic parameters (weights stored as (in, out)).
    table = jax.random.normal(k_tab, (num_embeddings, embedding_dim), jnp.float32)
    w1 = jax.random.normal(k_w1, (embedding_dim, embedding_dim), jnp.float32) * 0.1
    b1 = jax.random.normal(k_b1, (embedding_dim,), jnp.float32) * 0.1
    w2 = jax.random.normal(k_w2, (embedding_dim, embedding_dim), jnp.float32) * 0.1
    b2 = jax.random.normal(k_b2, (embedding_dim,), jnp.float32) * 0.1

    idx = jax.random.randint(k_idx, (B, S), 0, num_embeddings, dtype=jnp.int32)

    # Pad parameters once (hoisted out of the forward path).  Pass
    # compute_dtype=jnp.bfloat16 here for ~2x MXU throughput if tolerance allows.
    params = pad_params(table, w1, b1, w2, b2, compute_dtype=jnp.float32)

    out = integer_embedding_forward(idx, params)
    out = jax.block_until_ready(out)

    ref = _reference_forward(idx, table, w1, b1, w2, b2)
    assert out.shape == (B, S, embedding_dim)
    # Tolerance covers MXU pass-precision differences for f32 matmuls; real
    # bugs (wrong rows, missing bias/ReLU) produce O(0.1-1) errors.
    assert jnp.allclose(out, ref, atol=5e-3, rtol=5e-3), "mismatch vs JAX reference"

    print("KERNEL_OK")
</pallas_src>

<mosaic_0001>
module attributes {stable_mosaic.version = 11 : i64} {
  func.func @_int_embed_mlp_kernel(%arg0: i32, %arg1: memref<8x1xi32, #tpu.memory_space<vmem>>, %arg2: memref<128x128xf32, #tpu.memory_space<vmem>>, %arg3: memref<128x128xf32, #tpu.memory_space<vmem>>, %arg4: memref<1x128xf32, #tpu.memory_space<vmem>>, %arg5: memref<128x128xf32, #tpu.memory_space<vmem>>, %arg6: memref<1x128xf32, #tpu.memory_space<vmem>>, %arg7: memref<8x128xf32, #tpu.memory_space<vmem>>) attributes {dimension_semantics = [#tpu.dimension_semantics<parallel>], iteration_bounds = array<i64: 2>, scalar_prefetch = 0 : i64, scratch_operands = 0 : i64, tpu.core_type = #tpu.core_type<tc>, window_params = [{transform_indices = @transform_0, window_bounds = array<i64: 8, 1>}, {pipeline_mode = #tpu.pipeline_mode<synchronous>, transform_indices = @transform_1, window_bounds = array<i64: 128, 128>}, {pipeline_mode = #tpu.pipeline_mode<synchronous>, transform_indices = @transform_2, window_bounds = array<i64: 128, 128>}, {pipeline_mode = #tpu.pipeline_mode<synchronous>, transform_indices = @transform_3, window_bounds = array<i64: 1, 128>}, {pipeline_mode = #tpu.pipeline_mode<synchronous>, transform_indices = @transform_4, window_bounds = array<i64: 128, 128>}, {pipeline_mode = #tpu.pipeline_mode<synchronous>, transform_indices = @transform_5, window_bounds = array<i64: 1, 128>}, {transform_indices = @transform_6, window_bounds = array<i64: 8, 128>}]} {
    %c0 = arith.constant 0 : index
    %c0_0 = arith.constant 0 : index
    %0 = vector.load %arg1[%c0, %c0_0] : memref<8x1xi32, #tpu.memory_space<vmem>>, vector<8x1xi32>
    %1 = tpu.iota {dimensions = array<i32: 1>} : vector<8x128xi32>
    %2 = vector.broadcast %0 : vector<8x1xi32> to vector<8x128xi32>
    %3 = arith.cmpi eq, %2, %1 : vector<8x128xi32>
    %4 = arith.extui %3 : vector<8x128xi1> to vector<8x128xi32>
    %5 = arith.sitofp %4 : vector<8x128xi32> to vector<8x128xf32>
    %c0_1 = arith.constant 0 : index
    %c0_2 = arith.constant 0 : index
    %6 = vector.load %arg2[%c0_1, %c0_2] : memref<128x128xf32, #tpu.memory_space<vmem>>, vector<128x128xf32>
    %cst = arith.constant dense<0.000000e+00> : vector<8x128xf32>
    %7 = tpu.matmul %5, %6, %cst {dimension_numbers = #tpu.dot_dimension_numbers<[1], [0], [0], [1], [0, 0, 1, 1], [], []>} : vector<8x128xf32>, vector<128x128xf32>, vector<8x128xf32> -> vector<8x128xf32>
    %c0_3 = arith.constant 0 : index
    %c0_4 = arith.constant 0 : index
    %8 = vector.load %arg3[%c0_3, %c0_4] : memref<128x128xf32, #tpu.memory_space<vmem>>, vector<128x128xf32>
    %cst_5 = arith.constant dense<0.000000e+00> : vector<8x128xf32>
    %9 = tpu.matmul %7, %8, %cst_5 {dimension_numbers = #tpu.dot_dimension_numbers<[1], [0], [0], [1], [0, 0, 1, 1], [], []>} : vector<8x128xf32>, vector<128x128xf32>, vector<8x128xf32> -> vector<8x128xf32>
    %c0_6 = arith.constant 0 : index
    %c0_7 = arith.constant 0 : index
    %10 = vector.load %arg4[%c0_6, %c0_7] : memref<1x128xf32, #tpu.memory_space<vmem>>, vector<1x128xf32>
    %11 = vector.broadcast %10 : vector<1x128xf32> to vector<8x128xf32>
    %12 = arith.addf %9, %11 : vector<8x128xf32>
    %cst_8 = arith.constant 0.000000e+00 : f32
    %13 = vector.broadcast %cst_8 : f32 to vector<8x128xf32>
    %14 = arith.maximumf %12, %13 : vector<8x128xf32>
    %c0_9 = arith.constant 0 : index
    %c0_10 = arith.constant 0 : index
    %15 = vector.load %arg5[%c0_9, %c0_10] : memref<128x128xf32, #tpu.memory_space<vmem>>, vector<128x128xf32>
    %cst_11 = arith.constant dense<0.000000e+00> : vector<8x128xf32>
    %16 = tpu.matmul %14, %15, %cst_11 {dimension_numbers = #tpu.dot_dimension_numbers<[1], [0], [0], [1], [0, 0, 1, 1], [], []>} : vector<8x128xf32>, vector<128x128xf32>, vector<8x128xf32> -> vector<8x128xf32>
    %c0_12 = arith.constant 0 : index
    %c0_13 = arith.constant 0 : index
    %17 = vector.load %arg6[%c0_12, %c0_13] : memref<1x128xf32, #tpu.memory_space<vmem>>, vector<1x128xf32>
    %18 = vector.broadcast %17 : vector<1x128xf32> to vector<8x128xf32>
    %19 = arith.addf %16, %18 : vector<8x128xf32>
    %cst_14 = arith.constant 0.000000e+00 : f32
    %20 = vector.broadcast %cst_14 : f32 to vector<8x128xf32>
    %21 = arith.maximumf %19, %20 : vector<8x128xf32>
    %c0_15 = arith.constant 0 : index
    %c0_16 = arith.constant 0 : index
    %22 = vector.load %arg7[%c0_15, %c0_16] : memref<8x128xf32, #tpu.memory_space<vmem>>, vector<8x128xf32>
    tpu.vector_store %arg7[%c0_15, %c0_16], %21 {strides = array<i32>} : memref<8x128xf32, #tpu.memory_space<vmem>>, vector<8x128xf32>,
    return
  }
  func.func @transform_0(%arg0: i32) -> (i32, i32) {
    %c0_i32 = arith.constant 0 : i32
    %c0_i32_0 = arith.constant 0 : i32
    return %arg0, %c0_i32 : i32, i32
  }
  func.func @transform_1(%arg0: i32) -> (i32, i32) {
    %c0_i32 = arith.constant 0 : i32
    %c0_i32_0 = arith.constant 0 : i32
    %c0_i32_1 = arith.constant 0 : i32
    return %c0_i32, %c0_i32_0 : i32, i32
  }
  func.func @transform_2(%arg0: i32) -> (i32, i32) {
    %c0_i32 = arith.constant 0 : i32
    %c0_i32_0 = arith.constant 0 : i32
    %c0_i32_1 = arith.constant 0 : i32
    return %c0_i32, %c0_i32_0 : i32, i32
  }
  func.func @transform_3(%arg0: i32) -> (i32, i32) {
    %c0_i32 = arith.constant 0 : i32
    %c0_i32_0 = arith.constant 0 : i32
    %c0_i32_1 = arith.constant 0 : i32
    return %c0_i32, %c0_i32_0 : i32, i32
  }
  func.func @transform_4(%arg0: i32) -> (i32, i32) {
    %c0_i32 = arith.constant 0 : i32
    %c0_i32_0 = arith.constant 0 : i32
    %c0_i32_1 = arith.constant 0 : i32
    return %c0_i32, %c0_i32_0 : i32, i32
  }
  func.func @transform_5(%arg0: i32) -> (i32, i32) {
    %c0_i32 = arith.constant 0 : i32
    %c0_i32_0 = arith.constant 0 : i32
    %c0_i32_1 = arith.constant 0 : i32
    return %c0_i32, %c0_i32_0 : i32, i32
  }
  func.func @transform_6(%arg0: i32) -> (i32, i32) {
    %c0_i32 = arith.constant 0 : i32
    %c0_i32_0 = arith.constant 0 : i32
    return %arg0, %c0_i32 : i32, i32
  }
}

</mosaic_0001>

<bundles_post_ra>
// kernel: tpu_custom_call.1
= control target key start
LH: loop header
LB: loop body
LE: loop exit
PB: predicated region body
PF: predicated region fallthrough
CT: control target
= control target key end

     0   :  { %11 = vsyncpa [#allocation3], 0  ;;  %s1452_s0 = inlined_call_operand.vmem [shape: s32[16,1], index: 0, kind: input, shape index: {}]   ;;  %s1453_s1 = inlined_call_operand.hbm [shape: f32[128,128], index: 1, kind: input, shape index: {}]   ;;  %s1454_s2 = inlined_call_operand.hbm [shape: f32[128,128], index: 2, kind: input, shape index: {}]   ;;  %s1455_s3 = inlined_call_operand.vmem [shape: f32[1,128], index: 3, kind: input, shape index: {}]   ;;  %s1456_s4 = inlined_call_operand.hbm [shape: f32[128,128], index: 4, kind: input, shape index: {}]   ;;  %s1457_s5 = inlined_call_operand.vmem [shape: f32[1,128], index: 5, kind: input, shape index: {}]   ;;  %s1458_s6 = inlined_call_operand.hbm [shape: f32[16,128], index: 6, kind: output, shape index: {}]  }
   0x1   :  { %12 = vsyncpa [#allocation6], 0 }
   0x2   :  { %13 = vsyncpa [#allocation4], 0 }
   0x3   :  { %15 = vsyncpa [#allocation4 + $0x1], 0  ;;  %s1207_s21 = smov 0   ;;  %s1209_s22 = smov 0  }
   0x4   :  { %s1211_s23 = smov 0   ;;  %s1213_s24 = smov 0  }
   0x5 LB: > { %1463 = sst [smem:[#allocation12_spill]] %s1155_s23  ;;  %s1228_s25 = sadd.s32 4294967295, %s1159_s24   ;;  %s1159_s24 = sphi %s1213_s24, %s1481_s24   ;;  %s1155_s23 = sphi %s1211_s23, %s1478_s23   ;;  %s1151_s22 = sphi %s1209_s22, %s1480_s22   ;;  %s1147_s21 = sphi %s1207_s21, %s1479_s21  }
   0x6   : > { %s679_s26 = sadd.s32 4294967294, %s1159_s24   ;;  %s1232_s27 = sadd.s32 1, %s1159_s24  }
   0x7   : > { %s159_s28 = sadd.s32 1, %s1155_s23  ;;  %s156_s29 = ssub.s32 %s1159_s24, %s1232_s27 }
   0x8   : > { %p169_p0 = scmp.ne.s32.totalorder %s1155_s23, %s1151_s22  ;;  %p157_p1 = scmp.eq.s32.totalorder %s156_s29, 0 }
   0x9   : > { %p170_p2 = scmp.eq.s32.totalorder %s1228_s25, 1  ;;  %p175_p3 = scmp.ne.s32.totalorder %s1151_s22, %s1147_s21 }
   0xa   : > { %p176_p4 = scmp.eq.s32.totalorder %s679_s26, 1  ;;  %p680_p7 = scmp.ge.s32.totalorder %s1159_s24, 1 }
   0xb   : > { %s1243_s30 = scalar_select %p157_p1, %s1155_s23, %s159_s28  }
   0xc   : > { %p1245_p5 = por %p170_p2, %p169_p0  ;;  %p1249_p6 = por %p176_p4, %p175_p3 }
   0xd   : > { %1464 = sst [smem:[#allocation13_spill]] %s1243_s30  ;;  %p183_p8 = scmp.lt.s32.totalorder %s1159_s24, 3 }
   0xe   : > { %s1465_s7 = scalar_select %p1245_p5, 1, 0 }
   0xf   : > { %s1466_s8 = scalar_select %p1249_p6, 1, 0 }
  0x10   : > { %p1459_p9 = scmp.eq.s32.totalorder %s1228_s25, 0  ;;  %p1256_p10 = pnand %p680_p7, %p183_p8 }
  0x11   : > { %s1161_s10 = smov [#allocation5]   ;;  %s1162_s13 = smov [#allocation2]  }
  0x12   : > { %s1467_s9 = scalar_select %p1256_p10, 1, 0 }
  0x13   : > { %p941_p11 = pneg %p1256_p10  ;;  %s208_s11 = sshll.u32 %s1161_s10, 4  ;;  %s1262_s11 = int_to_ptr.vmem [resolvable:$true] %s208_s11 }
  0x14   : > { %s195_s14 = sshll.u32 %s1162_s13, 4  ;;  %s1163_s15 = smov [#allocation7]   ;;  %s1270_s14 = int_to_ptr.vmem [resolvable:$true] %s195_s14 }
  0x15   : > { %p1266_p12 = pnand %p1459_p9, %p941_p11  ;;  %s1272_s16 = sshll.u32 %s1163_s15, 4  ;;  %s225_s16 = int_to_ptr.vmem [resolvable:$true] %s1272_s16 }
  0x16   : > { %s1005_s19 = scalar_lea.hbm %s1454_s2, 2048 }
  0x17   : > { %p1006_p13 = scmp.ne.s32.totalorder %s1454_s2, %s1005_s19  ;;  %p1282_p0 = pneg %p1266_p12 }
  0x18   : > { %p1012_p3 = scmp.lt.u32.totalorder %s1005_s19, %s1454_s2 }
  0x19   : > { %p1008_p1 = pnand %p1282_p0, %p1006_p13 }
  0x1b   : > { %p1009_p2 = pneg %p1008_p1 }
  0x1d   : > { %p1014_p4 = pnand %p1012_p3, %p1009_p2 }
  0x1f   : > { %1017 = shalt.err (!%p1014_p4)
}
  0x20   : > { %s1018_s13 = scalar_lea.vmem %s1262_s11, 2048  ;;  %p1026_p9 = scmp.lt.s32.totalorder %s1262_s11, %s1262_s11 }
  0x21   : > { %p1019_p7 = scmp.ne.s32.totalorder %s1262_s11, %s1018_s13  ;;  %p1027_p6 = scmp.lt.s32.totalorder %s1018_s13, %s1018_s13 }
  0x23   : > { %p1021_p8 = pnand %p1019_p7, %p1282_p0  ;;  %p1028_p13 = por %p1027_p6, %p1026_p9 }
  0x25   : > { %p1022_p11 = pneg %p1021_p8 }
  0x27   : > { %p1029_p1 = pnand %p1028_p13, %p1022_p11 }
  0x29   : > { %1032 = shalt.err (!%p1029_p1)
}
  0x2a   : > { %s1164_s15 = smov 128   ;;  %s1165_s17 = smov 8  }
  0x2b   : > { %947 = dma.hbm_to_vmem [thread:$0]  (!%p1266_p12), %s1454_s2, 2048, %s1262_s11, [#allocation6], %s1164_s15, %s1164_s15, %s1165_s17  }
  0x2c   : > { %s1033_s29 = scalar_lea.hbm %s1453_s1, 2048 }
  0x2d   : > { %p1034_p6 = scmp.ne.s32.totalorder %s1453_s1, %s1033_s29  ;;  %p1040_p3 = scmp.lt.u32.totalorder %s1033_s29, %s1453_s1 }
  0x2f   : > { %p1036_p9 = pnand %p1034_p6, %p1282_p0 }
  0x31   : > { %p1037_p2 = pneg %p1036_p9 }
  0x33   : > { %p1042_p4 = pnand %p1040_p3, %p1037_p2 }
  0x35   : > { %1045 = shalt.err (!%p1042_p4)
}
  0x36   : > { %s1046_s11 = scalar_lea.vmem %s1270_s14, 2048  ;;  %p1054_p13 = scmp.lt.s32.totalorder %s1270_s14, %s1270_s14 }
  0x37   : > { %p1047_p7 = scmp.ne.s32.totalorder %s1270_s14, %s1046_s11  ;;  %p1055_p1 = scmp.lt.s32.totalorder %s1046_s11, %s1046_s11 }
  0x39   : > { %p1049_p8 = pnand %p1047_p7, %p1282_p0  ;;  %p1056_p6 = por %p1055_p1, %p1054_p13 }
  0x3b   : > { %p1050_p11 = pneg %p1049_p8 }
  0x3d   : > { %p1057_p9 = pnand %p1056_p6, %p1050_p11 }
  0x3f   : > { %1060 = shalt.err (!%p1057_p9)
}
  0x40   : > { %944 = dma.hbm_to_vmem [thread:$0]  (!%p1266_p12), %s1453_s1, 2048, %s1270_s14, [#allocation3], %s1164_s15, %s1164_s15, %s1165_s17  }
  0x41   : > { %s1061_s20 = scalar_lea.hbm %s1456_s4, 2048 }
  0x42   : > { %p1062_p2 = scmp.ne.s32.totalorder %s1456_s4, %s1061_s20  ;;  %p1068_p7 = scmp.lt.u32.totalorder %s1061_s20, %s1456_s4 }
  0x44   : > { %p1064_p3 = pnand %p1062_p2, %p1282_p0 }
  0x46   : > { %p1065_p4 = pneg %p1064_p3 }
  0x48   : > { %p1070_p8 = pnand %p1068_p7, %p1065_p4 }
  0x4a   : > { %1073 = shalt.err (!%p1070_p8)
}
  0x4b   : > { %s1074_s11 = scalar_lea.vmem %s225_s16, 2048  ;;  %p1082_p6 = scmp.lt.s32.totalorder %s225_s16, %s225_s16 }
  0x4c   : > { %p1075_p11 = scmp.ne.s32.totalorder %s225_s16, %s1074_s11  ;;  %p1083_p9 = scmp.lt.s32.totalorder %s1074_s11, %s1074_s11 }
  0x4e   : > { %p1077_p13 = pnand %p1075_p11, %p1282_p0  ;;  %p1084_p5 = por %p1083_p9, %p1082_p6 }
  0x50   : > { %p1078_p1 = pneg %p1077_p13 }
  0x52   : > { %p1085_p10 = pnand %p1084_p5, %p1078_p1 }
  0x54   : > { %1088 = shalt.err (!%p1085_p10)
}
  0x55   : > { %950 = dma.hbm_to_vmem [thread:$0]  (!%p1266_p12), %s1456_s4, 2048, %s225_s16, [#allocation6], %s1164_s15, %s1164_s15, %s1165_s17  }
  0x56   : > { %p1470_p2 = scmp.ne.s32.totalorder %s1467_s9, 0 }
  0x57   : > { %p1471_p0 = scmp.eq.s32.totalorder (!%p1470_p2), %s1228_s25, 0 }
  0x58   : > { %250 = sbr.rel (%p1470_p2) target bundleno = 893 (0x37d), region = 44 }
  0x5f   : > { %1134 = dma.done.wait (%p1471_p0), [#allocation3], 2048   ;;  %p1472_p3 = pmov %p1471_p0 }
  0x60   : > { %p1473_p5 = pmov %p1471_p0 }
  0x61   : > { %1136 = vsyncadd (%p1472_p3), [#allocation3], 4294965248 }
  0x62   : > { %1138 = dma.done.wait (%p1473_p5), [#allocation6], 4096   ;;  %p1474_p10 = pmov %p1471_p0 }
  0x63   : > { %p287_p4 = scmp.lt.s32.totalorder %s1228_s25, 1  ;;  %v1166_v0 = vmov 0   ;;  %v1167_v1 = vmov 0.0|0.0   ;;  %v300_v3 = vld [vmem:[#allocation2] sm:$0xff]  ;;  %v301_v4 = vld [vmem:[#allocation2 + $0x8] sm:$0xff]  ;;  %v302_v6 = vld [vmem:[#allocation2 + $0x10] sm:$0xff]  ;;  %v292_v52 = vlaneseq }
  0x64   : > { %1140 = vsyncadd (%p1474_p10), [#allocation6], 4294963200  ;;  %1004 = vset.pattern.permute.xlu0 %v1166_v0  ;;  %855 = vmatprep.subr.bf16.mxu0 %v1167_v1  ;;  %v856_v5 = vpack.c.bf16 %v301_v4, %v300_v3  ;;  %v303_v7 = vld [vmem:[#allocation2 + $0x18] sm:$0xff]  ;;  %vm1168_vm0 = vmmov 0   ;;  %v1169_v8 = vmov 0.0   ;;  %v304_v10 = vld [vmem:[#allocation2 + $0x20] sm:$0xff] }
  0x65   : > { %s288_s9 = scalar_select %p287_p4, %s1228_s25, 1  ;;  %879 = vmatprep.subr.bf16.mxu1 %v1167_v1  ;;  %782 = vmatprep.mubr.msk.f32.mxu0 %vm1168_vm0, %v1169_v8  ;;  %v859_v9 = vpack.c.bf16 %v303_v7, %v302_v6  ;;  %v305_v11 = vld [vmem:[#allocation2 + $0x28] sm:$0xff]  ;;  %v386_v12 = vld [vmem:[#allocation5] sm:$0xff]  ;;  %v388_v14 = vld [vmem:[#allocation5 + $0x10] sm:$0xff]  ;;  %v293_v53 = vand.u32 127, %v292_v52  ;;  %v1170_v55 = vmov 1.0  }
  0x66   : > { %817 = vmatprep.mubr.msk.f32.mxu1 %vm1168_vm0, %v1169_v8  ;;  %857 = vmatpush3.bf16.msra.mxu0 %v856_v5  ;;  %v387_v13 = vld [vmem:[#allocation5 + $0x8] sm:$0xff]  ;;  %v389_v15 = vld [vmem:[#allocation5 + $0x18] sm:$0xff]  ;;  %v862_v16 = vpack.c.bf16 %v305_v11, %v304_v10  ;;  %v306_v18 = vld [vmem:[#allocation2 + $0x30] sm:$0xff]  ;;  %s284_s18 = sand.u32 1, %s1151_s22   ;;  %s696_s29 = sshll.u32 %s1228_s25, 7 }
  0x67   : > { %s690_s12 = sshll.u32 %s288_s9, 3  ;;  %858 = vmatprep.subr.bf16.mxu0 %v1167_v1  ;;  %v880_v17 = vpack.c.bf16 %v387_v13, %v386_v12  ;;  %v307_v19 = vld [vmem:[#allocation2 + $0x38] sm:$0xff]  ;;  %v883_v20 = vpack.c.bf16 %v389_v15, %v388_v14  ;;  %v390_v21 = vld [vmem:[#allocation5 + $0x20] sm:$0xff]  ;;  %v391_v22 = vld [vmem:[#allocation5 + $0x28] sm:$0xff]  ;;  %s689_s19 = sshll.u32 %s284_s18, 3 }
  0x68   : > { %s290_s15 = scalar_lea.vmem %s1452_s0, %s690_s12  ;;  %v865_v23 = vpack.c.bf16 %v307_v19, %v306_v18  ;;  %v308_v24 = vld [vmem:[#allocation2 + $0x40] sm:$0xff]  ;;  %v309_v25 = vld [vmem:[#allocation2 + $0x48] sm:$0xff]  ;;  %v886_v26 = vpack.c.bf16 %v391_v22, %v390_v21  ;;  %v392_v27 = vld [vmem:[#allocation5 + $0x30] sm:$0xff]  ;;  %s286_s10 = scalar_lea.vmem [#allocation8], %s689_s19 }
  0x69   : > { %v291_v2 = vld [vmem:[%s290_s15] sm:$0xff]  ;;  %881 = vmatpush3.bf16.msra.mxu1 %v880_v17  ;;  %v393_v28 = vld [vmem:[#allocation5 + $0x38] sm:$0xff]  ;;  %v868_v29 = vpack.c.bf16 %v309_v25, %v308_v24  ;;  %v310_v30 = vld [vmem:[#allocation2 + $0x50] sm:$0xff]  ;;  %s589_s13 = sshll.u32 %s286_s10, 4  ;;  %s1410_s23 = scalar_lea.hbm %s1458_s6, %s696_s29  ;;  %s1412_s13 = int_to_ptr.vmem [resolvable:$true] %s589_s13 }
  0x6a   : > { %295 = vperm.xlu0 %1004, %v291_v2   ;;  %860 = vmatpush3.bf16.msra.mxu0 %v859_v9  ;;  %v311_v31 = vld [vmem:[#allocation2 + $0x58] sm:$0xff]  ;;  %v889_v32 = vpack.c.bf16 %v393_v28, %v392_v27  ;;  %v394_v33 = vld [vmem:[#allocation5 + $0x40] sm:$0xff]  ;;  %v395_v34 = vld [vmem:[#allocation5 + $0x48] sm:$0xff]  ;;  %s576_s9 = scalar_lea.sflag [#allocation4], %s284_s18  ;;  %s1089_s12 = scalar_lea.vmem %s1412_s13, 128 }
  0x6b   : > { %861 = vmatprep.subr.bf16.mxu0 %v1167_v1  ;;  %882 = vmatprep.subr.bf16.mxu1 %v1167_v1  ;;  %v871_v35 = vpack.c.bf16 %v311_v31, %v310_v30  ;;  %v312_v36 = vld [vmem:[#allocation2 + $0x60] sm:$0xff]  ;;  %v313_v37 = vld [vmem:[#allocation2 + $0x68] sm:$0xff]  ;;  %v892_v38 = vpack.c.bf16 %v395_v34, %v394_v33  ;;  %v396_v39 = vld [vmem:[#allocation5 + $0x50] sm:$0xff]  ;;  %p1090_p12 = scmp.ne.s32.totalorder %s1412_s13, %s1089_s12  ;;  %p1475_p7 = scmp.ne.s32.totalorder %s1465_s7, 0 }
  0x6c   : > { %v397_v40 = vld [vmem:[#allocation5 + $0x58] sm:$0xff]  ;;  %v874_v41 = vpack.c.bf16 %v313_v37, %v312_v36  ;;  %v314_v42 = vld [vmem:[#allocation2 + $0x70] sm:$0xff]  ;;  %v398_v45 = vld [vmem:[#allocation5 + $0x60] sm:$0xff]  ;;  %s1171_s25 = smov [#allocation8]  }
  0x6d   : > { %884 = vmatpush3.bf16.msra.mxu1 %v883_v20  ;;  %v315_v43 = vld [vmem:[#allocation2 + $0x78] sm:$0xff]  ;;  %v895_v44 = vpack.c.bf16 %v397_v40, %v396_v39  ;;  %v399_v46 = vld [vmem:[#allocation5 + $0x68] sm:$0xff]  ;;  %v400_v49 = vld [vmem:[#allocation5 + $0x70] sm:$0xff]  ;;  %p1091_p8 = pnand %p1090_p12, %p1475_p7  ;;  %s1093_s16 = sshll.u32 %s1171_s25, 4  ;;  %s1094_s16 = int_to_ptr.vmem [resolvable:$false] %s1093_s16 }
  0x6e   : > { %863 = vmatpush3.bf16.msra.mxu0 %v862_v16  ;;  %885 = vmatprep.subr.bf16.mxu1 %v1167_v1  ;;  %v877_v47 = vpack.c.bf16 %v315_v43, %v314_v42  ;;  %v898_v48 = vpack.c.bf16 %v399_v46, %v398_v45  ;;  %v401_v50 = vld [vmem:[#allocation5 + $0x78] sm:$0xff]  ;;  %v480_v56 = vld [vmem:[#allocation7] sm:$0xff]  ;;  %v481_v57 = vld [vmem:[#allocation7 + $0x8] sm:$0xff]  ;;  %s1095_s28 = scalar_lea.vmem %s1094_s16, 256  ;;  %p1096_p13 = scmp.lt.s32.totalorder %s1412_s13, %s1094_s16 }
  0x6f   : > { %864 = vmatprep.subr.bf16.mxu0 %v1167_v1  ;;  %v901_v51 = vpack.c.bf16 %v401_v50, %v400_v49  ;;  %v482_v58 = vld [vmem:[#allocation7 + $0x10] sm:$0xff]  ;;  %v904_v59 = vpack.c.bf16 %v481_v57, %v480_v56  ;;  %v483_v60 = vld [vmem:[#allocation7 + $0x18] sm:$0xff]  ;;  %v484_v62 = vld [vmem:[#allocation7 + $0x20] sm:$0xff]  ;;  %p1092_p11 = pneg %p1091_p8  ;;  %p1097_p1 = scmp.lt.s32.totalorder %s1095_s28, %s1089_s12 }
  0x70   : > { %v907_v61 = vpack.c.bf16 %v483_v60, %v482_v58  ;;  %v485_v63 = vld [vmem:[#allocation7 + $0x28] sm:$0xff]  ;;  %v486_v2 = vld [vmem:[#allocation7 + $0x30] sm:$0xff]  ;;  %v487_v3 = vld [vmem:[#allocation7 + $0x38] sm:$0xff] }
  0x71   : > { %887 = vmatpush3.bf16.msra.mxu1 %v886_v26  ;;  %v910_v0 = vpack.c.bf16 %v485_v63, %v484_v62  ;;  %v913_v4 = vpack.c.bf16 %v487_v3, %v486_v2  ;;  %v488_v5 = vld [vmem:[#allocation7 + $0x40] sm:$0xff]  ;;  %v489_v6 = vld [vmem:[#allocation7 + $0x48] sm:$0xff]  ;;  %v491_v9 = vld [vmem:[#allocation7 + $0x58] sm:$0xff]  ;;  %p1098_p6 = por %p1097_p1, %p1096_p13 }
  0x72   : > { %866 = vmatpush3.bf16.msra.mxu0 %v865_v23  ;;  %888 = vmatprep.subr.bf16.mxu1 %v1167_v1  ;;  %v916_v7 = vpack.c.bf16 %v489_v6, %v488_v5  ;;  %v492_v11 = vld [vmem:[#allocation7 + $0x60] sm:$0xff]  ;;  %v493_v12 = vld [vmem:[#allocation7 + $0x68] sm:$0xff]  ;;  %v494_v16 = vld [vmem:[#allocation7 + $0x70] sm:$0xff] }
  0x73   : > { %867 = vmatprep.subr.bf16.mxu0 %v1167_v1  ;;  %v922_v13 = vpack.c.bf16 %v493_v12, %v492_v11  ;;  %v495_v17 = vld [vmem:[#allocation7 + $0x78] sm:$0xff]  ;;  %v693_v19 = vld [vmem:[%s1455_s3] ss:$0 sm:$0xff]  ;;  %p1099_p9 = pnand %p1098_p6, %p1092_p11 }
  0x74   : > { %v925_v18 = vpack.c.bf16 %v495_v17, %v494_v16 }
  0x75   : > { %890 = vmatpush3.bf16.msra.mxu1 %v889_v32 }
  0x76   : > { %869 = vmatpush3.bf16.msra.mxu0 %v868_v29  ;;  %891 = vmatprep.subr.bf16.mxu1 %v1167_v1 }
  0x77   : > { %870 = vmatprep.subr.bf16.mxu0 %v1167_v1 }
  0x79   : > { %893 = vmatpush3.bf16.msra.mxu1 %v892_v38 }
  0x7a   : > { %872 = vmatpush3.bf16.msra.mxu0 %v871_v35  ;;  %894 = vmatprep.subr.bf16.mxu1 %v1167_v1 }
  0x7b   : > { %873 = vmatprep.subr.bf16.mxu0 %v1167_v1 }
  0x7d   : > { %896 = vmatpush3.bf16.msra.mxu1 %v895_v44 }
  0x7e   : > { %875 = vmatpush3.bf16.msra.mxu0 %v874_v41  ;;  %897 = vmatprep.subr.bf16.mxu1 %v1167_v1 }
  0x7f   : > { %876 = vmatprep.subr.bf16.mxu0 %v1167_v1 }
  0x81   : > { %899 = vmatpush3.bf16.msra.mxu1 %v898_v48 }
  0x82   : > { %878 = vmatpush3.bf16.msra.mxu0 %v877_v47  ;;  %900 = vmatprep.subr.bf16.mxu1 %v1167_v1 }
  0x83   : > { %903 = vmatprep.subr.bf16.mxu0 %v1167_v1 }
  0x85   : > { %902 = vmatpush3.bf16.msra.mxu1 %v901_v51 }
  0xe9   : > { %v296_v54 = vpop.permute.xlu0 %295 }
  0xea   : > { %vm297_vm1 = vcmp.eq.s32.totalorder %v296_v54, %v293_v53 }
  0xeb   : > { %783 = vmatmul.mubr.msk.f32.vlgmr.msra.gmra.mrb[0].mxu0 %vm297_vm1, %v1170_v55 }
  0xec   : > { %852 = vmatprep.mubr.msk.f32.mxu0 %vm1168_vm0, %v1169_v8  ;;  %905 = vmatpush3.bf16.msra.mxu0 %v904_v59  ;;  %v490_v8 = vld [vmem:[#allocation7 + $0x50] sm:$0xff] }
  0xed   : > { %906 = vmatprep.subr.bf16.mxu0 %v1167_v1  ;;  %v919_v10 = vpack.c.bf16 %v491_v9, %v490_v8 }
  0xf0   : > { %908 = vmatpush3.bf16.msra.mxu0 %v907_v61 }
  0xf1   : > { %909 = vmatprep.subr.bf16.mxu0 %v1167_v1 }
  0xf4   : > { %911 = vmatpush3.bf16.msra.mxu0 %v910_v0 }
  0xf5   : > { %912 = vmatprep.subr.bf16.mxu0 %v1167_v1 }
  0xf8   : > { %914 = vmatpush3.bf16.msra.mxu0 %v913_v4 }
  0xf9   : > { %915 = vmatprep.subr.bf16.mxu0 %v1167_v1 }
  0xfc   : > { %917 = vmatpush3.bf16.msra.mxu0 %v916_v7 }
  0xfd   : > { %918 = vmatprep.subr.bf16.mxu0 %v1167_v1 }
 0x100   : > { %920 = vmatpush3.bf16.msra.mxu0 %v919_v10 }
 0x101   : > { %921 = vmatprep.subr.bf16.mxu0 %v1167_v1 }
 0x104   : > { %923 = vmatpush3.bf16.msra.mxu0 %v922_v13 }
 0x105   : > { %924 = vmatprep.subr.bf16.mxu0 %v1167_v1  ;;  %v694_v1 = vld [vmem:[%s1457_s5] ss:$0 sm:$0xff] }
 0x108   : > { %926 = vmatpush3.bf16.msra.mxu0 %v925_v18 }
 0x1be   : > { %v382_v14 = vpop.f32.mrb[0].mxu0 }
 0x1bf   : > { %v784_v15 = vpop.f32.mrb[1].mxu0  ;;  %818 = vmatmul.mubr.f32.vlgmr.msra.gmra.mrb[0].mxu1 %v382_v14 }
 0x292   : > { %v475_v20 = vpop.f32.mrb[0].mxu1 }
 0x293   : > { %v476_v21 = vadd.f32 %v693_v19, %v475_v20  ;;  %v819_v22 = vpop.f32.mrb[1].mxu1 }
 0x295   : > { %v479_v23 = vmax.f32 %v476_v21, 0.0 }
 0x297   : > { %853 = vmatmul.mubr.f32.vlgmr.msra.gmra.mrb[2].mxu0 %v479_v23 }
 0x36a   : > { %v569_v24 = vpop.f32.mrb[2].mxu0 }
 0x36b   : > { %v570_v25 = vadd.f32 %v694_v1, %v569_v24  ;;  %v854_v26 = vpop.f32.mrb[3].mxu0 }
 0x36d   : > { %v573_v27 = vmax.f32 %v570_v25, 0.0 }
 0x36f   : > { %574 = vst [vmem:[%s286_s10] sm:$0xff] %v573_v27 }
 0x370   : > { %1102 = shalt.err (!%p1099_p9)
}
 0x371   : > { %s1103_s15 = scalar_lea.hbm %s1410_s23, 128  ;;  %s1107_s18 = scalar_lea.hbm %s1458_s6, 256 }
 0x372   : > { %p1104_p2 = scmp.ne.s32.totalorder %s1410_s23, %s1103_s15  ;;  %p1108_p5 = scmp.lt.u32.totalorder %s1410_s23, %s1458_s6 }
 0x373   : > { %p1109_p10 = scmp.lt.u32.totalorder %s1107_s18, %s1103_s15  ;;  %p1111_p12 = scmp.lt.u32.totalorder %s1103_s15, %s1410_s23 }
 0x374   : > { %p1105_p0 = pnand %p1104_p2, %p1475_p7 }
 0x375   : > { %p1110_p4 = por %p1109_p10, %p1108_p5 }
 0x376   : > { %p1106_p3 = pneg %p1105_p0 }
 0x377   : > { %p1112_p8 = por %p1111_p12, %p1110_p4 }
 0x379   : > { %p1113_p11 = pnand %p1112_p8, %p1106_p3 }
 0x37b   : > { %1116 = shalt.err (!%p1113_p11)
}
 0x37c   : > { %939 = dma.vmem_to_hbm [thread:$0]  (%p1475_p7), %s1412_s13, 128, %s1410_s23, %s576_s9  }
 0x37d PF: > { %p961_p13 = scmp.ge.s32.totalorder %s1159_s24, 2  ;;  %s601_s26 = sand.u32 1, %s1147_s21  }
 0x37e   : > { %p1476_p1 = scmp.ne.s32.totalorder %s1466_s8, 0  ;;  %s602_s29 = scalar_lea.sflag [#allocation4], %s601_s26 }
 0x380   : > { %p952_p6 = pnand %p961_p13, %p1476_p1 }
 0x382   : > { %1142 = dma.done.wait (!%p952_p6), %s602_s29, 128  }
 0x383   : > { %1144 = vsyncadd (!%p952_p6), %s602_s29, 4294967168  ;;  %s1477_s10 = sld [smem:[#allocation12_spill]]  ;;  %s1478_s23 = sld [smem:[#allocation13_spill]] }
 0x384   : > { %p18_p9 = scmp.ge.s32.totalorder %s1232_s27, 4   ;;  %s1479_s21 = smov %s1151_s22 }
 0x385   : > { %s1481_s24 = smov %s1232_s27 }
 0x386   :  { %20 = sbr.rel (!%p18_p9) target bundleno = 5 (0x5), region = 92 }
 0x389   : > { %s1480_s22 = smov %s1477_s10 }
 0x38d   :  { %607 = vsyncpa [#allocation3], 1 }
 0x38e   :  { %609 = vsyncpa [#allocation3 + $0x1], 1 }
 0x38f   :  { %610 = vsyncpa [#allocation6], 1 }
 0x390   :  { %611 = vsyncpa [#allocation4], 1 }
 0x391   :  { %613 = vsyncpa [#allocation4 + $0x1], 1 }

</bundles_post_ra>
